<compile_context>
chip_gen: v6e
topology: v6e:2x2x1
jax: 0.10.0
libtpu: 0.0.40
codegen_flags: <defaults>
</compile_context>

<pallas_src>
import functools

import jax
import jax.numpy as jnp
from jax.experimental import pallas as pl
from jax.experimental.pallas import tpu as pltpu


# ----------------------------------------------------------------------------
# Kernel body
# ----------------------------------------------------------------------------
def _mlp_kernel(x_ref, w1_ref, b1_ref, w2_ref, b2_ref, w3_ref, b3_ref, o_ref,
                *, chunk, unroll):
    # Weights: loaded once per grid step from VMEM-resident blocks.
    w1 = w1_ref[...]
    w2 = w2_ref[...]
    w3 = w3_ref[...]

    # Bias broadcasts hoisted out of the chunk loop (JAX does not CSE
    # broadcast_in_dim); biases stay f32 and are added to the f32 accumulator.
    b1 = jnp.broadcast_to(b1_ref[...], (chunk, w1.shape[1]))
    b2 = jnp.broadcast_to(b2_ref[...], (chunk, w2.shape[1]))
    b3 = jnp.broadcast_to(b3_ref[...], (chunk, w3.shape[1]))

    def compute(x):
        h = jnp.dot(x, w1, preferred_element_type=jnp.float32) + b1
        h = jnp.maximum(h, 0.0).astype(w2.dtype)
        h = jnp.dot(h, w2, preferred_element_type=jnp.float32) + b2
        h = jnp.maximum(h, 0.0).astype(w3.dtype)
        h = jnp.dot(h, w3, preferred_element_type=jnp.float32) + b3
        return jnp.maximum(h, 0.0)

    tile_rows = x_ref.shape[0]
    n_chunks = tile_rows // chunk

    if n_chunks == 1:
        o_ref[...] = compute(x_ref[...]).astype(o_ref.dtype)
    else:
        # Process the batch tile in `chunk`-row slabs: at chunk=128 the widest
        # per-layer activation is <= 16 vregs, so slabs stay out of VMEM spill
        # territory while the scheduler overlaps them.
        def body(c, carry):
            r = pl.multiple_of(c * chunk, chunk)
            x = x_ref[pl.ds(r, chunk), :]
            o_ref[pl.ds(r, chunk), :] = compute(x).astype(o_ref.dtype)
            return carry

        jax.lax.fori_loop(0, n_chunks, body, None, unroll=unroll)


# ----------------------------------------------------------------------------
# Wrapper
# ----------------------------------------------------------------------------
def _round_up(n, m):
    return ((n + m - 1) // m) * m


def _chip_generation():
    """Best-effort TPU generation detection (falls back to conservative)."""
    try:
        kind = jax.devices()[0].device_kind.lower()
    except Exception:  # no TPU visible at trace time
        return "other"
    if ("v5" in kind or "5e" in kind) and ("lite" in kind or "5e" in kind):
        return "v5e"
    if "v6" in kind or "6e" in kind:
        return "v6e"
    if "v7" in kind or "7x" in kind:
        return "v7x"
    return "other"


def internal_network_forward(x, params, *, tile_b=None, compute_dtype=None,
                             lane_dense_out=None):
    """Fused forward pass of internal_network.

    x: [B, n_dim + 1] float32
    params: dict with w1 [n_dim+1,120], b1 [1,120], w2 [120,60], b2 [1,60],
            w3 [60,10], b3 [1,10] (all float32)
    compute_dtype: None -> bf16 on v6e/v7x, f32 elsewhere. Explicit jnp.float32
                   gives the exact path; accumulation is always f32.
    returns: [B, 10] float32
    """
    B, F_in = x.shape
    H3 = params["w3"].shape[1]

    gen = _chip_generation()

    # ---- compute dtype (bf16 fast path on native-bf16-MXU chips) -----------
    if compute_dtype is None:
        compute_dtype = jnp.bfloat16 if gen in ("v6e", "v7x") else jnp.float32
    cdt = jnp.dtype(compute_dtype)
    row_align = 8 if cdt == jnp.dtype(jnp.float32) else 16  # bf16 sublane packing

    # ---- batch tile sizing --------------------------------------------------
    # Per-step VMEM ~= 2*tile*128*cdt + 2*tile*128*4 bytes (x/out lane-padded,
    # double buffered); caps keep v5e under its 16 MiB scoped-VMEM default.
    if tile_b is None:
        tile_cap = {"v5e": 2048, "v6e": 8192, "v7x": 8192}.get(gen, 4096)
    else:
        tile_cap = max(int(tile_b), row_align)
    if tile_cap >= 128:
        tile_cap = _round_up(tile_cap, 128)

    b_min = _round_up(B, row_align)

    if b_min <= 128:
        tile = b_min
    elif gen == "v7x" and 1024 <= b_min <= tile_cap:
        # 2 TensorCores: split into 2 parallel grid steps, each half >=512 rows.
        tile = _round_up(pl.cdiv(b_min, 2), 128)
    else:
        tile = min(tile_cap, _round_up(b_min, 128))
    tile = _round_up(tile, row_align)

    chunk = 128 if (tile >= 128 and tile % 128 == 0) else tile
    n_chunks = tile // chunk
    unroll = True if n_chunks <= 4 else 2

    # ---- ragged batch: pad to a multiple of the tile, slice after ----------
    b_pad = pl.cdiv(B, tile) * tile
    x_in = x if b_pad == B else jnp.pad(x, ((0, b_pad - B), (0, 0)))

    # ---- lane-dense output path --------------------------------------------
    if lane_dense_out is None:
        lane_dense_out = b_pad <= (1 << 18)  # skip for huge B (writeback bytes)
    if lane_dense_out and H3 < 128:
        H3k = 128
        w3 = jnp.pad(params["w3"], ((0, 0), (0, H3k - H3)))
        b3 = jnp.pad(params["b3"], ((0, 0), (0, H3k - H3)))
    else:
        H3k = H3
        w3 = params["w3"]
        b3 = params["b3"]

    # ---- dtype casts (biases stay f32, accumulation stays f32) -------------
    x_in = x_in.astype(cdt)
    w1 = params["w1"].astype(cdt)
    w2 = params["w2"].astype(cdt)
    w3 = w3.astype(cdt)
    b1, b2 = params["b1"], params["b2"]

    grid = (b_pad // tile,)

    # ---- VMEM limit & cost estimate -----------------------------------------
    dsize = cdt.itemsize
    vmem_needed = (2 * tile * 128 * dsize      # x blocks (lane-padded, dbl-buf)
                   + 2 * tile * 128 * 4        # out blocks
                   + (256 << 10))              # weights/biases + margin
    vmem_limit = int(min(max(2 * vmem_needed, 32 << 20), 48 << 20))

    flops = 2 * B * (F_in * 120 + 120 * 60 + 60 * H3)
    bytes_accessed = (B * F_in * dsize + B * H3 * 4
                      + (F_in * 120 + 120 * 60 + 60 * H3 + 190) * 4)
    cost = pl.CostEstimate(flops=flops, transcendentals=0,
                           bytes_accessed=bytes_accessed)

    def rep(shape):
        # Constant block index -> weights/biases stay VMEM-resident across steps.
        return pl.BlockSpec(shape, lambda i: (0, 0))

    out_pad = pl.pallas_call(
        functools.partial(_mlp_kernel, chunk=chunk, unroll=unroll),
        out_shape=jax.ShapeDtypeStruct((b_pad, H3k), jnp.float32),
        grid_spec=pltpu.PrefetchScalarGridSpec(
            num_scalar_prefetch=0,
            grid=grid,
            in_specs=[
                pl.BlockSpec((tile, F_in), lambda i: (i, 0)),  # x tile
                rep(w1.shape), rep(b1.shape),
                rep(w2.shape), rep(b2.shape),
                rep(w3.shape), rep(b3.shape),
            ],
            out_specs=pl.BlockSpec((tile, H3k), lambda i: (i, 0)),
        ),
        compiler_params=pltpu.CompilerParams(
            dimension_semantics=("parallel",),
            vmem_limit_bytes=vmem_limit),
        cost_estimate=cost,
    )(x_in, w1, b1, w2, b2, w3, b3)

    out = out_pad[:B] if b_pad != B else out_pad
    out = out[:, :H3] if H3k != H3 else out
    return out


# ----------------------------------------------------------------------------
# Params / references
# ----------------------------------------------------------------------------
def init_params(n_dim, key):
    """Deterministic init mimicking torch.nn.Linear default U(-1/sqrt(fan_in), +)."""
    dims = [(n_dim + 1, 120), (120, 60), (60, 10)]
    params = {}
    keys = jax.random.split(key, 2 * len(dims))
    for idx, (fan_in, fan_out) in enumerate(dims):
        bound = 1.0 / jnp.sqrt(jnp.float32(fan_in))
        w = jax.random.uniform(keys[2 * idx], (fan_in, fan_out),
                               minval=-bound, maxval=bound, dtype=jnp.float32)
        b = jax.random.uniform(keys[2 * idx + 1], (1, fan_out),
                               minval=-bound, maxval=bound, dtype=jnp.float32)
        params[f"w{idx + 1}"] = w
        params[f"b{idx + 1}"] = b
    return params


def reference_forward(x, params):
    h = jnp.maximum(x @ params["w1"] + params["b1"], 0.0)
    h = jnp.maximum(h @ params["w2"] + params["b2"], 0.0)
    h = jnp.maximum(h @ params["w3"] + params["b3"], 0.0)
    return h


def reference_forward_cast(x, params, compute_dtype):
    """Reference mimicking the kernel's low-precision compute path."""
    cdt = compute_dtype
    h = x.astype(cdt)
    for i in (1, 2, 3):
        w = params[f"w{i}"].astype(cdt)
        h = jnp.dot(h, w, preferred_element_type=jnp.float32) + params[f"b{i}"]
        h = jnp.maximum(h, 0.0)
        if i < 3:
            h = h.astype(cdt)
    return h


# ----------------------------------------------------------------------------
# Self-test
# ----------------------------------------------------------------------------
if __name__ == "__main__":
    n_dim = 4          # input features = n_dim + 1 = 5
    batch = 16

    key = jax.random.PRNGKey(0)
    k_x, k_p = jax.random.split(key)
    x = jax.random.normal(k_x, (batch, n_dim + 1), dtype=jnp.float32)
    params = init_params(n_dim, k_p)

    # Exact f32 path (jitted).
    fwd_f32 = jax.jit(functools.partial(internal_network_forward,
                                        compute_dtype=jnp.float32))
    out = jax.block_until_ready(fwd_f32(x, params))
    ref = reference_forward(x, params)
    assert out.shape == (batch, 10)
    assert jnp.allclose(out, ref, atol=1e-5, rtol=1e-5), "f32 mismatch"

    # Ragged batch (not a multiple of 8/16 or the tile) -> padding path.
    x_r = jax.random.normal(jax.random.PRNGKey(1), (batch + 3, n_dim + 1),
                            dtype=jnp.float32)
    out_r = jax.block_until_ready(
        internal_network_forward(x_r, params, compute_dtype=jnp.float32))
    assert out_r.shape == (batch + 3, 10)
    assert jnp.allclose(out_r, reference_forward(x_r, params),
                        atol=1e-5, rtol=1e-5), "ragged mismatch"

    # Larger batch, small forced tile -> multi grid step + chunk loop.
    x_big = jax.random.normal(jax.random.PRNGKey(2), (600, n_dim + 1),
                              dtype=jnp.float32)
    out_big = jax.block_until_ready(
        internal_network_forward(x_big, params, tile_b=256,
                                 compute_dtype=jnp.float32))
    assert jnp.allclose(out_big, reference_forward(x_big, params),
                        atol=1e-5, rtol=1e-5), "chunked/multi-step mismatch"

    # Same batch at the default tile -> single grid step, multi-chunk fori_loop.
    out_big2 = jax.block_until_ready(
        internal_network_forward(x_big, params, compute_dtype=jnp.float32))
    assert jnp.allclose(out_big2, reference_forward(x_big, params),
                        atol=1e-5, rtol=1e-5), "default-tile mismatch"

    # bf16 compute path (v6e/v7x fast path), loosened tolerance.
    out_bf16 = jax.block_until_ready(
        internal_network_forward(x, params, compute_dtype=jnp.bfloat16))
    ref_bf16 = reference_forward_cast(x, params, jnp.bfloat16)
    assert jnp.allclose(out_bf16, ref_bf16, atol=2e-2, rtol=2e-2), "bf16 mismatch"

    # Chip-auto default path (bf16 on v6e/v7x, f32 elsewhere).
    out_auto = jax.block_until_ready(internal_network_forward(x, params))
    assert out_auto.shape == (batch, 10)
    assert jnp.allclose(out_auto, ref, atol=5e-2, rtol=5e-2), "auto-path mismatch"

    print("KERNEL_OK")
</pallas_src>

<mosaic_0001>
module attributes {stable_mosaic.version = 11 : i64} {
  func.func @_mlp_kernel(%arg0: i32, %arg1: memref<16x5xf32, #tpu.memory_space<vmem>>, %arg2: memref<5x120xf32, #tpu.memory_space<vmem>>, %arg3: memref<1x120xf32, #tpu.memory_space<vmem>>, %arg4: memref<120x60xf32, #tpu.memory_space<vmem>>, %arg5: memref<1x60xf32, #tpu.memory_space<vmem>>, %arg6: memref<60x128xf32, #tpu.memory_space<vmem>>, %arg7: memref<1x128xf32, #tpu.memory_space<vmem>>, %arg8: memref<16x128xf32, #tpu.memory_space<vmem>>) attributes {dimension_semantics = [#tpu.dimension_semantics<parallel>], iteration_bounds = array<i64: 1>, scalar_prefetch = 0 : i64, scratch_operands = 0 : i64, tpu.core_type = #tpu.core_type<tc>, window_params = [{transform_indices = @transform_0, window_bounds = array<i64: 16, 5>}, {pipeline_mode = #tpu.pipeline_mode<synchronous>, transform_indices = @transform_1, window_bounds = array<i64: 5, 120>}, {pipeline_mode = #tpu.pipeline_mode<synchronous>, transform_indices = @transform_2, window_bounds = array<i64: 1, 120>}, {pipeline_mode = #tpu.pipeline_mode<synchronous>, transform_indices = @transform_3, window_bounds = array<i64: 120, 60>}, {pipeline_mode = #tpu.pipeline_mode<synchronous>, transform_indices = @transform_4, window_bounds = array<i64: 1, 60>}, {pipeline_mode = #tpu.pipeline_mode<synchronous>, transform_indices = @transform_5, window_bounds = array<i64: 60, 128>}, {pipeline_mode = #tpu.pipeline_mode<synchronous>, transform_indices = @transform_6, window_bounds = array<i64: 1, 128>}, {transform_indices = @transform_7, window_bounds = array<i64: 16, 128>}]} {
    %c0 = arith.constant 0 : index
    %c0_0 = arith.constant 0 : index
    %0 = vector.load %arg2[%c0, %c0_0] : memref<5x120xf32, #tpu.memory_space<vmem>>, vector<5x120xf32>
    %c0_1 = arith.constant 0 : index
    %c0_2 = arith.constant 0 : index
    %1 = vector.load %arg4[%c0_1, %c0_2] : memref<120x60xf32, #tpu.memory_space<vmem>>, vector<120x60xf32>
    %c0_3 = arith.constant 0 : index
    %c0_4 = arith.constant 0 : index
    %2 = vector.load %arg6[%c0_3, %c0_4] : memref<60x128xf32, #tpu.memory_space<vmem>>, vector<60x128xf32>
    %c0_5 = arith.constant 0 : index
    %c0_6 = arith.constant 0 : index
    %3 = vector.load %arg3[%c0_5, %c0_6] : memref<1x120xf32, #tpu.memory_space<vmem>>, vector<1x120xf32>
    %4 = vector.shape_cast %3 : vector<1x120xf32> to vector<1x120xf32>
    %5 = vector.broadcast %4 : vector<1x120xf32> to vector<16x120xf32>
    %c0_7 = arith.constant 0 : index
    %c0_8 = arith.constant 0 : index
    %6 = vector.load %arg5[%c0_7, %c0_8] : memref<1x60xf32, #tpu.memory_space<vmem>>, vector<1x60xf32>
    %7 = vector.shape_cast %6 : vector<1x60xf32> to vector<1x60xf32>
    %8 = vector.broadcast %7 : vector<1x60xf32> to vector<16x60xf32>
    %c0_9 = arith.constant 0 : index
    %c0_10 = arith.constant 0 : index
    %9 = vector.load %arg7[%c0_9, %c0_10] : memref<1x128xf32, #tpu.memory_space<vmem>>, vector<1x128xf32>
    %10 = vector.shape_cast %9 : vector<1x128xf32> to vector<1x128xf32>
    %11 = vector.broadcast %10 : vector<1x128xf32> to vector<16x128xf32>
    %c0_11 = arith.constant 0 : index
    %c0_12 = arith.constant 0 : index
    %12 = vector.load %arg1[%c0_11, %c0_12] : memref<16x5xf32, #tpu.memory_space<vmem>>, vector<16x5xf32>
    %cst = arith.constant dense<0.000000e+00> : vector<16x120xf32>
    %13 = tpu.matmul %12, %0, %cst {dimension_numbers = #tpu.dot_dimension_numbers<[1], [0], [0], [1], [0, 0, 1, 1], [], []>} : vector<16x5xf32>, vector<5x120xf32>, vector<16x120xf32> -> vector<16x120xf32>
    %14 = arith.addf %13, %5 : vector<16x120xf32>
    %cst_13 = arith.constant 0.000000e+00 : f32
    %15 = vector.broadcast %cst_13 : f32 to vector<16x120xf32>
    %16 = arith.maximumf %14, %15 : vector<16x120xf32>
    %cst_14 = arith.constant dense<0.000000e+00> : vector<16x60xf32>
    %17 = tpu.matmul %16, %1, %cst_14 {dimension_numbers = #tpu.dot_dimension_numbers<[1], [0], [0], [1], [0, 0, 1, 1], [], []>} : vector<16x120xf32>, vector<120x60xf32>, vector<16x60xf32> -> vector<16x60xf32>
    %18 = arith.addf %17, %8 : vector<16x60xf32>
    %cst_15 = arith.constant 0.000000e+00 : f32
    %19 = vector.broadcast %cst_15 : f32 to vector<16x60xf32>
    %20 = arith.maximumf %18, %19 : vector<16x60xf32>
    %cst_16 = arith.constant dense<0.000000e+00> : vector<16x128xf32>
    %21 = tpu.matmul %20, %2, %cst_16 {dimension_numbers = #tpu.dot_dimension_numbers<[1], [0], [0], [1], [0, 0, 1, 1], [], []>} : vector<16x60xf32>, vector<60x128xf32>, vector<16x128xf32> -> vector<16x128xf32>
    %22 = arith.addf %21, %11 : vector<16x128xf32>
    %cst_17 = arith.constant 0.000000e+00 : f32
    %23 = vector.broadcast %cst_17 : f32 to vector<16x128xf32>
    %24 = arith.maximumf %22, %23 : vector<16x128xf32>
    %c0_18 = arith.constant 0 : index
    %c0_19 = arith.constant 0 : index
    %25 = vector.load %arg8[%c0_18, %c0_19] : memref<16x128xf32, #tpu.memory_space<vmem>>, vector<16x128xf32>
    tpu.vector_store %arg8[%c0_18, %c0_19], %24 {strides = array<i32>} : memref<16x128xf32, #tpu.memory_space<vmem>>, vector<16x128xf32>,
    return
  }
  func.func @transform_0(%arg0: i32) -> (i32, i32) {
    %c0_i32 = arith.constant 0 : i32
    %c0_i32_0 = arith.constant 0 : i32
    return %arg0, %c0_i32 : i32, i32
  }
  func.func @transform_1(%arg0: i32) -> (i32, i32) {
    %c0_i32 = arith.constant 0 : i32
    %c0_i32_0 = arith.constant 0 : i32
    %c0_i32_1 = arith.constant 0 : i32
    return %c0_i32, %c0_i32_0 : i32, i32
  }
  func.func @transform_2(%arg0: i32) -> (i32, i32) {
    %c0_i32 = arith.constant 0 : i32
    %c0_i32_0 = arith.constant 0 : i32
    %c0_i32_1 = arith.constant 0 : i32
    return %c0_i32, %c0_i32_0 : i32, i32
  }
  func.func @transform_3(%arg0: i32) -> (i32, i32) {
    %c0_i32 = arith.constant 0 : i32
    %c0_i32_0 = arith.constant 0 : i32
    %c0_i32_1 = arith.constant 0 : i32
    return %c0_i32, %c0_i32_0 : i32, i32
  }
  func.func @transform_4(%arg0: i32) -> (i32, i32) {
    %c0_i32 = arith.constant 0 : i32
    %c0_i32_0 = arith.constant 0 : i32
    %c0_i32_1 = arith.constant 0 : i32
    return %c0_i32, %c0_i32_0 : i32, i32
  }
  func.func @transform_5(%arg0: i32) -> (i32, i32) {
    %c0_i32 = arith.constant 0 : i32
    %c0_i32_0 = arith.constant 0 : i32
    %c0_i32_1 = arith.constant 0 : i32
    return %c0_i32, %c0_i32_0 : i32, i32
  }
  func.func @transform_6(%arg0: i32) -> (i32, i32) {
    %c0_i32 = arith.constant 0 : i32
    %c0_i32_0 = arith.constant 0 : i32
    %c0_i32_1 = arith.constant 0 : i32
    return %c0_i32, %c0_i32_0 : i32, i32
  }
  func.func @transform_7(%arg0: i32) -> (i32, i32) {
    %c0_i32 = arith.constant 0 : i32
    %c0_i32_0 = arith.constant 0 : i32
    return %arg0, %c0_i32 : i32, i32
  }
}

</mosaic_0001>

<bundles_post_ra>
// kernel: internal_network_forward.1
= control target key start
LH: loop header
LB: loop body
LE: loop exit
PB: predicated region body
PF: predicated region fallthrough
CT: control target
= control target key end

     0   :  { %vm81_vm0 = vcmask 1044480   ;;  %vm74_vm1 = vcmask 39936   ;;  %s608_s0 = inlined_call_operand.vmem [shape: f32[16,5], index: 0, kind: input, shape index: {}]   ;;  %s609_s1 = inlined_call_operand.vmem [shape: f32[5,120], index: 1, kind: input, shape index: {}]   ;;  %s610_s2 = inlined_call_operand.vmem [shape: f32[1,120], index: 2, kind: input, shape index: {}]   ;;  %s611_s3 = inlined_call_operand.vmem [shape: f32[120,60], index: 3, kind: input, shape index: {}]   ;;  %s612_s4 = inlined_call_operand.vmem [shape: f32[1,60], index: 4, kind: input, shape index: {}]   ;;  %s613_s5 = inlined_call_operand.vmem [shape: f32[60,128], index: 5, kind: input, shape index: {}]   ;;  %s614_s6 = inlined_call_operand.vmem [shape: f32[1,128], index: 6, kind: input, shape index: {}]   ;;  %s615_s7 = inlined_call_operand.hbm [shape: f32[16,128], index: 7, kind: output, shape index: {}]  }
   0x1   :  { %v27_v0 = vld [vmem:[%s609_s1] sm:$0x1f]  ;;  %v73_v2 = vld [vmem:[%s608_s0 + $0x8] sm:$0xff]  ;;  %v42_v3 = vld [vmem:[%s611_s3 + $0x70] sm:$0xff] }
   0x2   :  { %v72_v1 = vld [vmem:[%s608_s0] sm:$0xff]  ;;  %393 = vmatprep.subr.msk.mxu0 %vm81_vm0, %v27_v0  ;;  %v41_v4 = vld [vmem:[%s611_s3 + $0x68] sm:$0xff]  ;;  %398 = vmatprep.subr.mxu1 %v42_v3 }
   0x3   :  { %395 = vmatprep.mubr.msk.f32.mxu0 %vm74_vm1, %v72_v1  ;;  %394 = vmatpush3.msk.msra.mxu0 %vm81_vm0, %v27_v0  ;;  %v40_v5 = vld [vmem:[%s611_s3 + $0x60] sm:$0xff] }
   0x4   :  { %396 = vmatmul.mubr.msk.f32.vlgmr.msra.gmra.mxu0 %vm74_vm1, %v73_v2  ;;  %399 = vmatpush3.msra.mxu1 %v42_v3 }
   0x5   :  { %400 = vmatprep.subr.mxu1 %v41_v4 }
   0x6   :  { %12 = vsyncpa [#allocation3], 0  ;;  %401 = vmatpush3.msra.mxu1 %v41_v4  ;;  %v39_v6 = vld [vmem:[%s611_s3 + $0x58] sm:$0xff]  ;;  %v38_v7 = vld [vmem:[%s611_s3 + $0x50] sm:$0xff]  ;;  %vm253_vm2 = vcmask 1043456   ;;  %vm162_vm3 = vcmask 982016  }
   0x7   :  { %402 = vmatprep.subr.mxu1 %v40_v5  ;;  %v37_v8 = vld [vmem:[%s611_s3 + $0x48] sm:$0xff]  ;;  %v36_v9 = vld [vmem:[%s611_s3 + $0x40] sm:$0xff]  ;;  %v35_v10 = vld [vmem:[%s611_s3 + $0x38] sm:$0xff]  ;;  %vm246_vm4 = vcmask 490496  }
   0x8   :  { %403 = vmatpush3.msra.mxu1 %v40_v5  ;;  %v34_v11 = vld [vmem:[%s611_s3 + $0x30] sm:$0xff]  ;;  %v33_v12 = vld [vmem:[%s611_s3 + $0x28] sm:$0xff]  ;;  %v32_v13 = vld [vmem:[%s611_s3 + $0x20] sm:$0xff] }
   0x9   :  { %404 = vmatprep.subr.mxu1 %v39_v6  ;;  %v31_v14 = vld [vmem:[%s611_s3 + $0x18] sm:$0xff]  ;;  %v30_v15 = vld [vmem:[%s611_s3 + $0x10] sm:$0xff]  ;;  %v29_v16 = vld [vmem:[%s611_s3 + $0x8] sm:$0xff] }
   0xa   :  { %405 = vmatpush3.msra.mxu1 %v39_v6  ;;  %v28_v17 = vld [vmem:[%s611_s3] sm:$0xff]  ;;  %v50_v18 = vld [vmem:[%s613_s5 + $0x38] sm:$0xf]  ;;  %v49_v19 = vld [vmem:[%s613_s5 + $0x30] sm:$0xff] }
   0xb   :  { %406 = vmatprep.subr.mxu1 %v38_v7  ;;  %431 = vmatprep.subr.msk.mxu0 %vm253_vm2, %v50_v18  ;;  %v48_v20 = vld [vmem:[%s613_s5 + $0x28] sm:$0xff]  ;;  %v47_v21 = vld [vmem:[%s613_s5 + $0x20] sm:$0xff]  ;;  %v46_v29 = vld [vmem:[%s613_s5 + $0x18] sm:$0xff] }
   0xc   :  { %407 = vmatpush3.msra.mxu1 %v38_v7  ;;  %432 = vmatpush3.msk.msra.mxu0 %vm253_vm2, %v50_v18  ;;  %v352_v22 = vld [vmem:[%s610_s2] ss:$0 sm:$0xff]  ;;  %v45_v30 = vld [vmem:[%s613_s5 + $0x10] sm:$0xff]  ;;  %v44_v31 = vld [vmem:[%s613_s5 + $0x8] sm:$0xff] }
   0xd   :  { %408 = vmatprep.subr.mxu1 %v37_v8  ;;  %433 = vmatprep.subr.mxu0 %v49_v19  ;;  %v43_v32 = vld [vmem:[%s613_s5] sm:$0xff]  ;;  %s475_s5 = smov [#allocation2]  }
   0xe   :  { %409 = vmatpush3.msra.mxu1 %v37_v8  ;;  %434 = vmatpush3.msra.mxu0 %v49_v19  ;;  %v353_v33 = vld [vmem:[%s612_s4] ss:$0 sm:$0xff]  ;;  %s341_s30 = sshll.u32 %s475_s5, 4  ;;  %s342_s30 = int_to_ptr.vmem [resolvable:$true] %s341_s30 }
   0xf   :  { %410 = vmatprep.subr.mxu1 %v36_v9  ;;  %435 = vmatprep.subr.mxu0 %v48_v20  ;;  %v354_v40 = vld [vmem:[%s614_s6] ss:$0 sm:$0xff]  ;;  %s453_s4 = scalar_lea.vmem %s342_s30, 256  ;;  %p458_p1 = scmp.lt.s32.totalorder %s342_s30, %s342_s30 }
  0x10   :  { %411 = vmatpush3.msra.mxu1 %v36_v9  ;;  %436 = vmatpush3.msra.mxu0 %v48_v20  ;;  %p454_p0 = scmp.ne.s32.totalorder %s342_s30, %s453_s4  ;;  %p459_p2 = scmp.lt.s32.totalorder %s453_s4, %s453_s4 }
  0x11   :  { %412 = vmatprep.subr.mxu1 %v35_v10  ;;  %437 = vmatprep.subr.mxu0 %v47_v21 }
  0x12   :  { %413 = vmatpush3.msra.mxu1 %v35_v10  ;;  %438 = vmatpush3.msra.mxu0 %v47_v21  ;;  %p460_p3 = por %p459_p2, %p458_p1 }
  0x13   :  { %414 = vmatprep.subr.mxu1 %v34_v11  ;;  %439 = vmatprep.subr.mxu0 %v46_v29 }
  0x14   :  { %415 = vmatpush3.msra.mxu1 %v34_v11  ;;  %440 = vmatpush3.msra.mxu0 %v46_v29  ;;  %p461_p4 = pnand %p460_p3, %p454_p0 }
  0x15   :  { %416 = vmatprep.subr.mxu1 %v33_v12  ;;  %441 = vmatprep.subr.mxu0 %v45_v30 }
  0x16   :  { %417 = vmatpush3.msra.mxu1 %v33_v12  ;;  %442 = vmatpush3.msra.mxu0 %v45_v30 }
  0x17   :  { %418 = vmatprep.subr.mxu1 %v32_v13  ;;  %443 = vmatprep.subr.mxu0 %v44_v31 }
  0x18   :  { %419 = vmatpush3.msra.mxu1 %v32_v13  ;;  %444 = vmatpush3.msra.mxu0 %v44_v31 }
  0x19   :  { %420 = vmatprep.subr.mxu1 %v31_v14  ;;  %445 = vmatprep.subr.mxu0 %v43_v32 }
  0x1a   :  { %421 = vmatpush3.msra.mxu1 %v31_v14  ;;  %446 = vmatpush3.msra.mxu0 %v43_v32 }
  0x1b   :  { %422 = vmatprep.subr.mxu1 %v30_v15 }
  0x1c   :  { %423 = vmatpush3.msra.mxu1 %v30_v15 }
  0x1d   :  { %424 = vmatprep.subr.mxu1 %v29_v16 }
  0x1e   :  { %425 = vmatpush3.msra.mxu1 %v29_v16 }
  0x1f   :  { %426 = vmatprep.subr.mxu1 %v28_v17 }
  0x20   :  { %427 = vmatpush3.msra.mxu1 %v28_v17 }
  0xc4   :  { %v397_v23 = vpop.f32.mrf.mxu0 }
  0xc5   :  { %v157_v24 = vadd.f32 %v397_v23, %v352_v22 }
  0xc6   :  { %v151_v25 = vpop.f32.mrf.mxu0 }
  0xc7   :  { %v152_v26 = vadd.f32 %v352_v22, %v151_v25  ;;  %v161_v28 = vmax.f32 %v157_v24, 0.0 }
  0xc9   :  { %v160_v27 = vmax.f32 %v152_v26, 0.0 }
  0xcb   :  { %428 = vmatprep.mubr.msk.f32.mxu1 %vm162_vm3, %v160_v27 }
  0xcc   :  { %429 = vmatmul.mubr.msk.f32.vlgmr.msra.gmra.mxu1 %vm162_vm3, %v161_v28 }
 0x18c   :  { %v430_v34 = vpop.f32.mrf.mxu1 }
 0x18d   :  { %v241_v35 = vadd.f32 %v430_v34, %v353_v33 }
 0x18e   :  { %v235_v36 = vpop.f32.mrf.mxu1 }
 0x18f   :  { %v236_v37 = vadd.f32 %v353_v33, %v235_v36  ;;  %v245_v39 = vmax.f32 %v241_v35, 0.0 }
 0x191   :  { %v244_v38 = vmax.f32 %v236_v37, 0.0 }
 0x193   :  { %447 = vmatprep.mubr.msk.f32.mxu0 %vm246_vm4, %v244_v38 }
 0x194   :  { %448 = vmatmul.mubr.msk.f32.vlgmr.msra.gmra.mxu0 %vm246_vm4, %v245_v39 }
 0x254   :  { %v449_v41 = vpop.f32.mrf.mxu0 }
 0x255   :  { %v329_v42 = vadd.f32 %v449_v41, %v354_v40 }
 0x256   :  { %v323_v43 = vpop.f32.mrf.mxu0 }
 0x257   :  { %v333_v44 = vmax.f32 %v329_v42, 0.0  ;;  %v324_v45 = vadd.f32 %v354_v40, %v323_v43 }
 0x259   :  { %335 = vst [vmem:[#allocation2 + $0x8] sm:$0xff] %v333_v44  ;;  %v332_v46 = vmax.f32 %v324_v45, 0.0 }
 0x25b   :  { %334 = vst [vmem:[#allocation2] sm:$0xff] %v332_v46 }
 0x25c   :  { %464 = shalt.err (!%p461_p4)
}
 0x25d   :  { %s476_s8 = smov 128   ;;  %s477_s6 = smov 8  }
 0x25e   :  { %347 = dma.vmem_to_hbm [thread:$0]  %s342_s30, 256, %s615_s7, [#allocation3], %s476_s8, %s476_s8, %s477_s6  }
 0x25f   :  { %473 = dma.done.wait [#allocation3], 256  }
 0x260   :  { %474 = vsyncadd [#allocation3], 4294967040 }
 0x261   :  { %351 = vsyncpa [#allocation3], 1 }

</bundles_post_ra>
